<compile_context>
chip_gen: v7x
topology: tpu7x:2x2x1
jax: 0.10.0
libtpu: 0.0.40
codegen_flags: <defaults>
</compile_context>

<pallas_src>
import jax
import jax.numpy as jnp
from jax import lax
from jax.experimental import pallas as pl
from jax.experimental.pallas import tpu as pltpu

_LANE = 128
_MAX_BLOCK_ROWS = 8192          # (8192,128) f32 block = 4 MiB / input / buffer
_NUM_CORES = 2                  # leading grid axis; real split on megacore parts
_MIN_PALLAS_ELEMENTS = 1 << 20  # below this, plain XLA wins (launch overhead)
_VMEM_LIMIT_BYTES = 48 << 20    # safe on v5e/v6e (128 MiB) and v7x (64 MiB)

# dimension_semantics candidates: CORE_PARALLEL makes the 2-slot split land on
# both TensorCores on megacore chips; plain "parallel" is the proven fallback.
_SEM_CHOICES = (
    (pltpu.CORE_PARALLEL, pltpu.ARBITRARY),
    ("parallel", "arbitrary"),
)
_sem_cache = []   # remembers the first dimension_semantics that compiled/ran


def _sublane_multiple(dtype):
    """Native sublane tile rows: 8 for 4-byte, 16 for 2-byte, 32 for 1-byte."""
    itemsize = jnp.dtype(dtype).itemsize
    return 32 // max(1, min(4, itemsize))


def _make_loss_sums_kernel(nb, bpc, block_rows, valid_rows):
    """Kernel accumulating per-block sums of (x-y)^2 and |x-y| into compact
    (8, 128) per-core partials.

    nb         : total number of (block_rows, 128) blocks (static python int)
    bpc        : blocks assigned per core slot (static python int)
    block_rows : rows per block (static python int, multiple of 8)
    valid_rows : number of valid rows in the 2-D view (static python int)
    """
    needs_mask = (nb * block_rows) != valid_rows

    def kernel(x_ref, y_ref, acc_ref):
        c = pl.program_id(0)   # core slot (CORE_PARALLEL / parallel axis)
        i = pl.program_id(1)   # block within this core (arbitrary axis)

        @pl.when(i == 0)
        def _init():
            acc_ref[...] = jnp.zeros_like(acc_ref)

        blk = c * bpc + i

        # Skip duplicate (clamped) blocks when nb is odd / smaller than the
        # 2-way split; their contribution must be zero.
        @pl.when(blk < nb)
        def _accum():
            d = x_ref[...].astype(jnp.float32) - y_ref[...].astype(jnp.float32)
            if needs_mask:
                # Mask rows of the (overhanging) last block that lie past the
                # end of the input; the DMA pad region is garbage otherwise.
                row = blk * block_rows + lax.broadcasted_iota(
                    jnp.int32, (block_rows, _LANE), 0)
                d = jnp.where(row < valid_rows, d, 0.0)
            # Fold the block down to one vreg per term: sublane-split reshape
            # (layout preserving) + leading-axis sum = pure VPU adds.
            sq = jnp.sum((d * d).reshape(block_rows // 8, 8, _LANE), axis=0)
            ab = jnp.sum(jnp.abs(d).reshape(block_rows // 8, 8, _LANE), axis=0)
            acc_ref[0, 0, :, :] = acc_ref[0, 0, :, :] + sq
            acc_ref[0, 1, :, :] = acc_ref[0, 1, :, :] + ab

    return kernel


def _run_partials(x2, y2, nb, bpc, block_rows, valid_rows):
    """Runs the Pallas reduction; returns (NUM_CORES, 2, 8, 128) f32 partials."""
    kernel = _make_loss_sums_kernel(nb, bpc, block_rows, valid_rows)

    def in_map(c, i):
        # Clamp so the DMA is always in-bounds; duplicate blocks are masked
        # out inside the kernel via @pl.when(blk < nb).
        return (jnp.minimum(c * bpc + i, nb - 1), 0)

    def build(sem):
        return pl.pallas_call(
            kernel,
            out_shape=jax.ShapeDtypeStruct(
                (_NUM_CORES, 2, 8, _LANE), jnp.float32),
            grid_spec=pltpu.PrefetchScalarGridSpec(
                num_scalar_prefetch=0,
                grid=(_NUM_CORES, bpc),
                in_specs=[
                    pl.BlockSpec((block_rows, _LANE), in_map),
                    pl.BlockSpec((block_rows, _LANE), in_map),
                ],
                out_specs=pl.BlockSpec(
                    (1, 2, 8, _LANE), lambda c, i: (c, 0, 0, 0)),
            ),
            compiler_params=pltpu.CompilerParams(
                dimension_semantics=sem,
                vmem_limit_bytes=_VMEM_LIMIT_BYTES),
        )

    choices = tuple(_sem_cache) if _sem_cache else _SEM_CHOICES
    last_err = None
    for sem in choices:
        try:
            out = jax.block_until_ready(build(sem)(x2, y2))
            if not _sem_cache:
                _sem_cache.append(sem)
            return out
        except Exception as e:   # e.g. CORE_PARALLEL unsupported on this part
            last_err = e
    raise last_err


def _jax_sums(a, b):
    d = a.astype(jnp.float32) - b.astype(jnp.float32)
    return jnp.sum(d * d), jnp.sum(jnp.abs(d))


def _loss_sums(fake, real, *, min_pallas_elements=_MIN_PALLAS_ELEMENTS,
               max_block_rows=_MAX_BLOCK_ROWS):
    """Returns (sum_sq, sum_abs, n_elements)."""
    assert fake.shape == real.shape
    x = jnp.ravel(fake)
    y = jnp.ravel(real)
    n = x.size
    assert n > 0, "empty input to loss"

    # Small-input bypass: kernel launch + partials round-trip dominate here.
    if n < min_pallas_elements:
        sum_sq, sum_abs = _jax_sums(x, y)
        return sum_sq, sum_abs, n

    s = max(_sublane_multiple(x.dtype), _sublane_multiple(y.dtype))
    rows_total = n // _LANE
    rows_s = (rows_total // s) * s      # rows usable under native (s,128) tiling

    sum_sq = jnp.float32(0.0)
    sum_abs = jnp.float32(0.0)
    n_main = 0

    if rows_s > 0:
        block_rows = min(max_block_rows, rows_s)   # both multiples of s (>= 8)
        nb = pl.cdiv(rows_s, block_rows)           # last block may be partial
        bpc = pl.cdiv(nb, _NUM_CORES)              # blocks per core slot
        n_main = rows_s * _LANE

        x2 = (x if n_main == n else x[:n_main]).reshape(rows_s, _LANE)
        y2 = (y if n_main == n else y[:n_main]).reshape(rows_s, _LANE)

        partials = _run_partials(x2, y2, nb, bpc, block_rows, rows_s)

        # Final tree reduction of the tiny lane-dense partials in plain JAX.
        sums = jnp.sum(partials, axis=(0, 2, 3))
        sum_sq = sums[0]
        sum_abs = sums[1]

    if n_main < n:
        # Tiny sub-(s*128 + 128)-element remainder only.
        t_sq, t_abs = _jax_sums(x[n_main:], y[n_main:])
        sum_sq = sum_sq + t_sq
        sum_abs = sum_abs + t_abs

    return sum_sq, sum_abs, n


class PallasLoss:
    """JAX/Pallas equivalent of the PyTorch `Loss` module.

    loss_spec: string "w0*TYPE0+w1*TYPE1+..." with TYPE in {MSE, L1, RMSE}.
    """

    def __init__(self, loss_spec="1*MSE+1*L1+0.5*RMSE", *,
                 min_pallas_elements=_MIN_PALLAS_ELEMENTS):
        self.min_pallas_elements = min_pallas_elements
        self.loss = []
        for loss in loss_spec.split('+'):
            weight, loss_type = loss.split('*')
            if loss_type not in ('MSE', 'L1', 'RMSE'):
                # TODO(synk): FaceSphere / GanLoss require external modules.
                raise NotImplementedError(
                    'Loss [{:s}] not recognized.'.format(loss_type))
            self.loss.append({'type': loss_type, 'weight': float(weight)})

    def __call__(self, fake, real, step=0, is_train=True):
        sum_sq, sum_abs, n = _loss_sums(
            fake, real, min_pallas_elements=self.min_pallas_elements)
        mse = sum_sq / n           # nn.MSELoss (mean reduction)
        l1 = sum_abs / n           # nn.L1Loss  (mean reduction)
        rmse = jnp.sqrt(mse)       # RMSELoss
        table = {'MSE': mse, 'L1': l1, 'RMSE': rmse}

        losses = []
        loss_sum = jnp.zeros((1,), jnp.float32)  # torch.zeros(1)
        for l in self.loss:
            loss = table[l['type']]
            losses.append({'loss': loss, 'type': l['type'],
                           'weight': l['weight']})
            loss_sum = l['weight'] * loss + loss_sum
        return loss_sum, losses


def _reference(fake, real, spec):
    d = fake.astype(jnp.float32) - real.astype(jnp.float32)
    mse = jnp.mean(d * d)
    l1 = jnp.mean(jnp.abs(d))
    rmse = jnp.sqrt(mse)
    table = {'MSE': mse, 'L1': l1, 'RMSE': rmse}
    total = jnp.float32(0.0)
    for term in spec.split('+'):
        w, t = term.split('*')
        total = total + float(w) * table[t]
    return total


if __name__ == "__main__":
    spec = "1*MSE+1*L1+0.5*RMSE"
    loss_mod = PallasLoss(spec)                              # default (bypass for small n)
    loss_force = PallasLoss(spec, min_pallas_elements=0)     # always use the Pallas kernel

    key = jax.random.PRNGKey(0)
    k1, k2 = jax.random.split(key)

    # Primary check: shape implied by the module (NCHW image batch), run
    # through the Pallas kernel (forced) and through the small-input bypass.
    fake = jax.random.normal(k1, (2, 4, 16, 16), dtype=jnp.float32)
    real = jax.random.normal(k2, (2, 4, 16, 16), dtype=jnp.float32)
    ref0 = _reference(fake, real, spec)

    loss_sum, losses = loss_force(fake, real, step=0, is_train=True)
    loss_sum = jax.block_until_ready(loss_sum)
    assert loss_sum.shape == (1,)
    assert jnp.allclose(loss_sum[0], ref0, rtol=1e-5, atol=1e-5)

    ls_bypass, _ = loss_mod(fake, real, step=0, is_train=True)
    ls_bypass = jax.block_until_ready(ls_bypass)
    assert jnp.allclose(ls_bypass[0], ref0, rtol=1e-5, atol=1e-5)

    # Check 2: unaligned size -> exercises kernel + tiny plain-JAX tail.
    k3, k4 = jax.random.split(k1)
    f2 = jax.random.normal(k3, (3, 3, 17, 13), dtype=jnp.float32)
    r2 = jax.random.normal(k4, (3, 3, 17, 13), dtype=jnp.float32)
    ls2, _ = loss_force(f2, r2)
    ls2 = jax.block_until_ready(ls2)
    assert jnp.allclose(ls2[0], _reference(f2, r2, spec), rtol=1e-4, atol=1e-5)

    # Check 3: bf16 inputs -> exercises the 16-row sublane-packed tiling path.
    k5, k6 = jax.random.split(k2)
    f3 = jax.random.normal(k5, (2, 4, 32, 32), dtype=jnp.bfloat16)
    r3 = jax.random.normal(k6, (2, 4, 32, 32), dtype=jnp.bfloat16)
    ls3, _ = loss_force(f3, r3)
    ls3 = jax.block_until_ready(ls3)
    assert jnp.allclose(ls3[0], _reference(f3, r3, spec), rtol=1e-4, atol=1e-5)

    # Check 4: >1M elements (default threshold path), odd block count and a
    # masked partial last block -> exercises the two-core split + row mask.
    k7, k8 = jax.random.split(k3)
    f4 = jax.random.normal(k7, (1, 3, 700, 512), dtype=jnp.float32)
    r4 = jax.random.normal(k8, (1, 3, 700, 512), dtype=jnp.float32)
    ls4, _ = loss_mod(f4, r4)
    ls4 = jax.block_until_ready(ls4)
    assert jnp.allclose(ls4[0], _reference(f4, r4, spec), rtol=1e-4, atol=1e-5)

    print("KERNEL_OK")
</pallas_src>

<mosaic_0001>
module attributes {stable_mosaic.version = 11 : i64} {
  func.func @kernel(%arg0: i32, %arg1: i32, %arg2: memref<16x128xf32, #tpu.memory_space<vmem>>, %arg3: memref<16x128xf32, #tpu.memory_space<vmem>>, %arg4: memref<1x2x8x128xf32, #tpu.memory_space<vmem>>) attributes {dimension_semantics = [#tpu.dimension_semantics<core_parallel>, #tpu.dimension_semantics<arbitrary>], iteration_bounds = array<i64: 2, 1>, scalar_prefetch = 0 : i64, scratch_operands = 0 : i64, tpu.core_type = #tpu.core_type<tc>, window_params = [{transform_indices = @transform_0, window_bounds = array<i64: 16, 128>}, {transform_indices = @transform_1, window_bounds = array<i64: 16, 128>}, {transform_indices = @transform_2, window_bounds = array<i64: 1, 2, 8, 128>}]} {
    %c0_i32 = arith.constant 0 : i32
    %0 = arith.cmpi eq, %arg1, %c0_i32 : i32
    %1 = arith.extui %0 : i1 to i32
    %c0_i32_0 = arith.constant 0 : i32
    %2 = arith.cmpi ne, %1, %c0_i32_0 : i32
    scf.if %2 {
      %cst = arith.constant 0.000000e+00 : f32
      %8 = vector.broadcast %cst : f32 to vector<1x2x8x128xf32>
      %c0 = arith.constant 0 : index
      %c0_3 = arith.constant 0 : index
      %c0_4 = arith.constant 0 : index
      %c0_5 = arith.constant 0 : index
      %9 = vector.load %arg4[%c0, %c0_3, %c0_4, %c0_5] : memref<1x2x8x128xf32, #tpu.memory_space<vmem>>, vector<1x2x8x128xf32>
      tpu.vector_store %arg4[%c0, %c0_3, %c0_4, %c0_5], %8 {strides = array<i32>} : memref<1x2x8x128xf32, #tpu.memory_space<vmem>>, vector<1x2x8x128xf32>,
    } else {
    }
    %c1_i32 = arith.constant 1 : i32
    %3 = arith.muli %arg0, %c1_i32 : i32
    %4 = arith.addi %3, %arg1 : i32
    %c1_i32_1 = arith.constant 1 : i32
    %5 = arith.cmpi slt, %4, %c1_i32_1 : i32
    %6 = arith.extui %5 : i1 to i32
    %c0_i32_2 = arith.constant 0 : i32
    %7 = arith.cmpi ne, %6, %c0_i32_2 : i32
    scf.if %7 {
      %c0 = arith.constant 0 : index
      %c0_3 = arith.constant 0 : index
      %8 = vector.load %arg2[%c0, %c0_3] : memref<16x128xf32, #tpu.memory_space<vmem>>, vector<16x128xf32>
      %c0_4 = arith.constant 0 : index
      %c0_5 = arith.constant 0 : index
      %9 = vector.load %arg3[%c0_4, %c0_5] : memref<16x128xf32, #tpu.memory_space<vmem>>, vector<16x128xf32>
      %10 = arith.subf %8, %9 : vector<16x128xf32>
      %11 = arith.mulf %10, %10 : vector<16x128xf32>
      %12 = vector.shape_cast %11 : vector<16x128xf32> to vector<2x8x128xf32>
      %cst = arith.constant dense<0.000000e+00> : vector<8x128xf32>
      %13 = vector.multi_reduction <add>, %12, %cst [0] : vector<2x8x128xf32> to vector<8x128xf32>
      %14 = math.absf %10 : vector<16x128xf32>
      %15 = vector.shape_cast %14 : vector<16x128xf32> to vector<2x8x128xf32>
      %cst_6 = arith.constant dense<0.000000e+00> : vector<8x128xf32>
      %16 = vector.multi_reduction <add>, %15, %cst_6 [0] : vector<2x8x128xf32> to vector<8x128xf32>
      %c0_7 = arith.constant 0 : index
      %c0_8 = arith.constant 0 : index
      %c0_9 = arith.constant 0 : index
      %c0_10 = arith.constant 0 : index
      %17 = vector.load %arg4[%c0_7, %c0_8, %c0_9, %c0_10] : memref<1x2x8x128xf32, #tpu.memory_space<vmem>>, vector<1x1x8x128xf32>
      %18 = vector.shape_cast %17 : vector<1x1x8x128xf32> to vector<8x128xf32>
      %19 = arith.addf %18, %13 : vector<8x128xf32>
      %c0_11 = arith.constant 0 : index
      %c0_12 = arith.constant 0 : index
      %c0_13 = arith.constant 0 : index
      %c0_14 = arith.constant 0 : index
      %20 = vector.load %arg4[%c0_11, %c0_12, %c0_13, %c0_14] : memref<1x2x8x128xf32, #tpu.memory_space<vmem>>, vector<1x1x8x128xf32>
      %21 = vector.shape_cast %20 : vector<1x1x8x128xf32> to vector<8x128xf32>
      %22 = vector.shape_cast %19 : vector<8x128xf32> to vector<1x1x8x128xf32>
      tpu.vector_store %arg4[%c0_11, %c0_12, %c0_13, %c0_14], %22 {strides = array<i32>} : memref<1x2x8x128xf32, #tpu.memory_space<vmem>>, vector<1x1x8x128xf32>,
      %c0_15 = arith.constant 0 : index
      %c1 = arith.constant 1 : index
      %c0_16 = arith.constant 0 : index
      %c0_17 = arith.constant 0 : index
      %23 = vector.load %arg4[%c0_15, %c1, %c0_16, %c0_17] : memref<1x2x8x128xf32, #tpu.memory_space<vmem>>, vector<1x1x8x128xf32>
      %24 = vector.shape_cast %23 : vector<1x1x8x128xf32> to vector<8x128xf32>
      %25 = arith.addf %24, %16 : vector<8x128xf32>
      %c0_18 = arith.constant 0 : index
      %c1_19 = arith.constant 1 : index
      %c0_20 = arith.constant 0 : index
      %c0_21 = arith.constant 0 : index
      %26 = vector.load %arg4[%c0_18, %c1_19, %c0_20, %c0_21] : memref<1x2x8x128xf32, #tpu.memory_space<vmem>>, vector<1x1x8x128xf32>
      %27 = vector.shape_cast %26 : vector<1x1x8x128xf32> to vector<8x128xf32>
      %28 = vector.shape_cast %25 : vector<8x128xf32> to vector<1x1x8x128xf32>
      tpu.vector_store %arg4[%c0_18, %c1_19, %c0_20, %c0_21], %28 {strides = array<i32>} : memref<1x2x8x128xf32, #tpu.memory_space<vmem>>, vector<1x1x8x128xf32>,
    } else {
    }
    return
  }
  func.func @transform_0(%arg0: i32, %arg1: i32) -> (i32, i32) {
    %c1_i32 = arith.constant 1 : i32
    %0 = arith.muli %arg0, %c1_i32 : i32
    %1 = arith.addi %0, %arg1 : i32
    %c0_i32 = arith.constant 0 : i32
    %2 = arith.minsi %1, %c0_i32 : i32
    %c0_i32_0 = arith.constant 0 : i32
    %c0_i32_1 = arith.constant 0 : i32
    return %2, %c0_i32_0 : i32, i32
  }
  func.func @transform_1(%arg0: i32, %arg1: i32) -> (i32, i32) {
    %c1_i32 = arith.constant 1 : i32
    %0 = arith.muli %arg0, %c1_i32 : i32
    %1 = arith.addi %0, %arg1 : i32
    %c0_i32 = arith.constant 0 : i32
    %2 = arith.minsi %1, %c0_i32 : i32
    %c0_i32_0 = arith.constant 0 : i32
    %c0_i32_1 = arith.constant 0 : i32
    return %2, %c0_i32_0 : i32, i32
  }
  func.func @transform_2(%arg0: i32, %arg1: i32) -> (i32, i32, i32, i32) {
    %c0_i32 = arith.constant 0 : i32
    %c0_i32_0 = arith.constant 0 : i32
    %c0_i32_1 = arith.constant 0 : i32
    %c0_i32_2 = arith.constant 0 : i32
    return %arg0, %c0_i32, %c0_i32_0, %c0_i32_1 : i32, i32, i32, i32
  }
}

module attributes {stable_mosaic.version = 11 : i64} {
  func.func @kernel(%arg0: i32, %arg1: i32, %arg2: memref<16x128xf32, #tpu.memory_space<vmem>>, %arg3: memref<16x128xf32, #tpu.memory_space<vmem>>, %arg4: memref<1x2x8x128xf32, #tpu.memory_space<vmem>>) attributes {dimension_semantics = [#tpu.dimension_semantics<parallel>, #tpu.dimension_semantics<arbitrary>], iteration_bounds = array<i64: 2, 1>, scalar_prefetch = 0 : i64, scratch_operands = 0 : i64, tpu.core_type = #tpu.core_type<tc>, window_params = [{transform_indices = @transform_0, window_bounds = array<i64: 16, 128>}, {transform_indices = @transform_1, window_bounds = array<i64: 16, 128>}, {transform_indices = @transform_2, window_bounds = array<i64: 1, 2, 8, 128>}]} {
    %c0_i32 = arith.constant 0 : i32
    %0 = arith.cmpi eq, %arg1, %c0_i32 : i32
    %1 = arith.extui %0 : i1 to i32
    %c0_i32_0 = arith.constant 0 : i32
    %2 = arith.cmpi ne, %1, %c0_i32_0 : i32
    scf.if %2 {
      %cst = arith.constant 0.000000e+00 : f32
      %8 = vector.broadcast %cst : f32 to vector<1x2x8x128xf32>
      %c0 = arith.constant 0 : index
      %c0_3 = arith.constant 0 : index
      %c0_4 = arith.constant 0 : index
      %c0_5 = arith.constant 0 : index
      %9 = vector.load %arg4[%c0, %c0_3, %c0_4, %c0_5] : memref<1x2x8x128xf32, #tpu.memory_space<vmem>>, vector<1x2x8x128xf32>
      tpu.vector_store %arg4[%c0, %c0_3, %c0_4, %c0_5], %8 {strides = array<i32>} : memref<1x2x8x128xf32, #tpu.memory_space<vmem>>, vector<1x2x8x128xf32>,
    } else {
    }
    %c1_i32 = arith.constant 1 : i32
    %3 = arith.muli %arg0, %c1_i32 : i32
    %4 = arith.addi %3, %arg1 : i32
    %c1_i32_1 = arith.constant 1 : i32
    %5 = arith.cmpi slt, %4, %c1_i32_1 : i32
    %6 = arith.extui %5 : i1 to i32
    %c0_i32_2 = arith.constant 0 : i32
    %7 = arith.cmpi ne, %6, %c0_i32_2 : i32
    scf.if %7 {
      %c0 = arith.constant 0 : index
      %c0_3 = arith.constant 0 : index
      %8 = vector.load %arg2[%c0, %c0_3] : memref<16x128xf32, #tpu.memory_space<vmem>>, vector<16x128xf32>
      %c0_4 = arith.constant 0 : index
      %c0_5 = arith.constant 0 : index
      %9 = vector.load %arg3[%c0_4, %c0_5] : memref<16x128xf32, #tpu.memory_space<vmem>>, vector<16x128xf32>
      %10 = arith.subf %8, %9 : vector<16x128xf32>
      %11 = arith.mulf %10, %10 : vector<16x128xf32>
      %12 = vector.shape_cast %11 : vector<16x128xf32> to vector<2x8x128xf32>
      %cst = arith.constant dense<0.000000e+00> : vector<8x128xf32>
      %13 = vector.multi_reduction <add>, %12, %cst [0] : vector<2x8x128xf32> to vector<8x128xf32>
      %14 = math.absf %10 : vector<16x128xf32>
      %15 = vector.shape_cast %14 : vector<16x128xf32> to vector<2x8x128xf32>
      %cst_6 = arith.constant dense<0.000000e+00> : vector<8x128xf32>
      %16 = vector.multi_reduction <add>, %15, %cst_6 [0] : vector<2x8x128xf32> to vector<8x128xf32>
      %c0_7 = arith.constant 0 : index
      %c0_8 = arith.constant 0 : index
      %c0_9 = arith.constant 0 : index
      %c0_10 = arith.constant 0 : index
      %17 = vector.load %arg4[%c0_7, %c0_8, %c0_9, %c0_10] : memref<1x2x8x128xf32, #tpu.memory_space<vmem>>, vector<1x1x8x128xf32>
      %18 = vector.shape_cast %17 : vector<1x1x8x128xf32> to vector<8x128xf32>
      %19 = arith.addf %18, %13 : vector<8x128xf32>
      %c0_11 = arith.constant 0 : index
      %c0_12 = arith.constant 0 : index
      %c0_13 = arith.constant 0 : index
      %c0_14 = arith.constant 0 : index
      %20 = vector.load %arg4[%c0_11, %c0_12, %c0_13, %c0_14] : memref<1x2x8x128xf32, #tpu.memory_space<vmem>>, vector<1x1x8x128xf32>
      %21 = vector.shape_cast %20 : vector<1x1x8x128xf32> to vector<8x128xf32>
      %22 = vector.shape_cast %19 : vector<8x128xf32> to vector<1x1x8x128xf32>
      tpu.vector_store %arg4[%c0_11, %c0_12, %c0_13, %c0_14], %22 {strides = array<i32>} : memref<1x2x8x128xf32, #tpu.memory_space<vmem>>, vector<1x1x8x128xf32>,
      %c0_15 = arith.constant 0 : index
      %c1 = arith.constant 1 : index
      %c0_16 = arith.constant 0 : index
      %c0_17 = arith.constant 0 : index
      %23 = vector.load %arg4[%c0_15, %c1, %c0_16, %c0_17] : memref<1x2x8x128xf32, #tpu.memory_space<vmem>>, vector<1x1x8x128xf32>
      %24 = vector.shape_cast %23 : vector<1x1x8x128xf32> to vector<8x128xf32>
      %25 = arith.addf %24, %16 : vector<8x128xf32>
      %c0_18 = arith.constant 0 : index
      %c1_19 = arith.constant 1 : index
      %c0_20 = arith.constant 0 : index
      %c0_21 = arith.constant 0 : index
      %26 = vector.load %arg4[%c0_18, %c1_19, %c0_20, %c0_21] : memref<1x2x8x128xf32, #tpu.memory_space<vmem>>, vector<1x1x8x128xf32>
      %27 = vector.shape_cast %26 : vector<1x1x8x128xf32> to vector<8x128xf32>
      %28 = vector.shape_cast %25 : vector<8x128xf32> to vector<1x1x8x128xf32>
      tpu.vector_store %arg4[%c0_18, %c1_19, %c0_20, %c0_21], %28 {strides = array<i32>} : memref<1x2x8x128xf32, #tpu.memory_space<vmem>>, vector<1x1x8x128xf32>,
    } else {
    }
    return
  }
  func.func @transform_0(%arg0: i32, %arg1: i32) -> (i32, i32) {
    %c1_i32 = arith.constant 1 : i32
    %0 = arith.muli %arg0, %c1_i32 : i32
    %1 = arith.addi %0, %arg1 : i32
    %c0_i32 = arith.constant 0 : i32
    %2 = arith.minsi %1, %c0_i32 : i32
    %c0_i32_0 = arith.constant 0 : i32
    %c0_i32_1 = arith.constant 0 : i32
    return %2, %c0_i32_0 : i32, i32
  }
  func.func @transform_1(%arg0: i32, %arg1: i32) -> (i32, i32) {
    %c1_i32 = arith.constant 1 : i32
    %0 = arith.muli %arg0, %c1_i32 : i32
    %1 = arith.addi %0, %arg1 : i32
    %c0_i32 = arith.constant 0 : i32
    %2 = arith.minsi %1, %c0_i32 : i32
    %c0_i32_0 = arith.constant 0 : i32
    %c0_i32_1 = arith.constant 0 : i32
    return %2, %c0_i32_0 : i32, i32
  }
  func.func @transform_2(%arg0: i32, %arg1: i32) -> (i32, i32, i32, i32) {
    %c0_i32 = arith.constant 0 : i32
    %c0_i32_0 = arith.constant 0 : i32
    %c0_i32_1 = arith.constant 0 : i32
    %c0_i32_2 = arith.constant 0 : i32
    return %arg0, %c0_i32, %c0_i32_0, %c0_i32_1 : i32, i32, i32, i32
  }
}

</mosaic_0001>

<bundles_post_ra>
// kernel: tpu_custom_call.1
= control target key start
LH: loop header
LB: loop body
LE: loop exit
PB: predicated region body
PF: predicated region fallthrough
CT: control target
= control target key end

     0   :  { %7 = vsyncpa [#allocation3], 0  ;;  %s912_s0 = inlined_call_operand.hbm [shape: f32[16,128], index: 0, kind: input, shape index: {}]   ;;  %s913_s1 = inlined_call_operand.hbm [shape: f32[16,128], index: 1, kind: input, shape index: {}]   ;;  %s914_s2 = inlined_call_operand.hbm [shape: f32[2,2,8,128], index: 2, kind: output, shape index: {}]  }
   0x1   :  { %9 = vsyncpa [#allocation3 + $0x1], 0 }
   0x2   :  { %10 = vsyncpa [#allocation6], 0 }
   0x3   :  { %12 = vsyncpa [#allocation6 + $0x1], 0 }
   0x4   :  { %13 = vsyncpa [#allocation4], 0 }
   0x5   :  { %15 = vsyncpa [#allocation4 + $0x1], 0  ;;  %s701_s9 = smov 0   ;;  %s703_s10 = smov 0  }
   0x6   :  { %s705_s11 = smov 0   ;;  %s707_s12 = smov 0  }
   0x7   :  { %s709_s13 = smov 0   ;;  %s711_s14 = smov 0  }
   0x8   :  { %s713_s15 = smov 0   ;;  %s715_s16 = smov 0  }
   0x9 LB: > { %s388_s17 = sadd.s32 4294967295, %s676_s16   ;;  %s389_s18 = sadd.s32 4294967294, %s676_s16   ;;  %s676_s16 = sphi %s715_s16, %s21_s16   ;;  %s672_s15 = sphi %s713_s15, %s933_s15   ;;  %s668_s14 = sphi %s711_s14, %s932_s14   ;;  %s664_s13 = sphi %s709_s13, %s902_s13   ;;  %s660_s12 = sphi %s707_s12, %s931_s12   ;;  %s656_s11 = sphi %s705_s11, %s930_s11   ;;  %s652_s10 = sphi %s703_s10, %s929_s10   ;;  %s648_s9 = sphi %s701_s9, %s928_s9  }
   0xa   : > { %s33_s19 = sadd.s32 1, %s672_s15  ;;  %p645_p1 = scmp.ne.s32.totalorder %s664_s13, 0 }
   0xb   : > { %p35_p0 = scmp.ge.s32.totalorder %s33_s19, 2  ;;  %p54_p2 = scmp.eq.s32.totalorder %s676_s16, 0 }
   0xc   : > { %p59_p3 = scmp.ne.s32.totalorder %s664_s13, %s660_s12  ;;  %p60_p5 = scmp.eq.s32.totalorder %s388_s17, 0 }
   0xd   : > { %s935_s19 = smov (%p35_p0, %s33_s19), 0  ;;  %p747_p4 = por %p645_p1, %p54_p2 }
   0xe   : > { %p751_p6 = por %p60_p5, %p59_p3  ;;  %s101_s22 = ssub.s32 %s672_s15, %s935_s19 }
   0xf   : > { %p102_p7 = scmp.eq.s32.totalorder %s101_s22, 0  ;;  %s104_s23 = sadd.s32 1, %s656_s11 }
  0x10   : > { %s918_s21 = scalar_select %p751_p6, 1, 0 }
  0x11   : > { %s759_s24 = scalar_select %p102_p7, %s656_s11, %s104_s23  }
  0x12   : > { %p114_p8 = scmp.ne.s32.totalorder %s656_s11, %s652_s10  ;;  %p115_p9 = scmp.eq.s32.totalorder %s388_s17, 1 }
  0x13   : > { %p120_p10 = scmp.ne.s32.totalorder %s652_s10, %s648_s9  ;;  %p121_p11 = scmp.eq.s32.totalorder %s389_s18, 1 }
  0x14   : > { %p765_p12 = por %p115_p9, %p114_p8  ;;  %p430_p1 = scmp.lt.s32.totalorder %s676_s16, 2 }
  0x15   : > { %p770_p0 = por %p121_p11, %p120_p10  ;;  %s678_s27 = smov [#allocation2]  }
  0x16   : > { %s919_s25 = scalar_select %p765_p12, 1, 0 }
  0x17   : > { %s920_s26 = scalar_select %p770_p0, 1, 0 }
  0x18   : > { %s155_s28 = sshll.u32 %s678_s27, 4  ;;  %p777_p2 = pnand %p430_p1, %p747_p4  ;;  %s156_s28 = int_to_ptr.vmem [resolvable:$true] %s155_s28 }
  0x19   : > { %s509_s4 = scalar_lea.hbm %s912_s0, 256 }
  0x1a   : > { %p510_p3 = scmp.ne.s32.totalorder %s912_s0, %s509_s4  ;;  %p511_p5 = pneg %p777_p2 }
  0x1b   : > { %p516_p8 = scmp.lt.u32.totalorder %s509_s4, %s509_s4  ;;  %p518_p9 = scmp.lt.u32.totalorder %s509_s4, %s912_s0 }
  0x1c   : > { %p512_p7 = pnand %p511_p5, %p510_p3 }
  0x1d   : > { %p519_p10 = por %p518_p9, %p516_p8 }
  0x1e   : > { %p513_p4 = pneg %p512_p7 }
  0x20   : > { %p520_p11 = pnand %p519_p10, %p513_p4 }
  0x22   : > { %523 = shalt.err (!%p520_p11)
}
  0x23   : > { %s524_s12 = scalar_lea.vmem %s156_s28, 256  ;;  %s531_s17 = scalar_lea.vmem %s156_s28, 512 }
  0x24   : > { %p525_p1 = scmp.ne.s32.totalorder %s156_s28, %s524_s12  ;;  %p532_p12 = scmp.lt.s32.totalorder %s156_s28, %s156_s28 }
  0x25   : > { %p533_p6 = scmp.lt.s32.totalorder %s531_s17, %s524_s12 }
  0x26   : > { %p527_p13 = pnand %p525_p1, %p511_p5 }
  0x27   : > { %p534_p3 = por %p533_p6, %p532_p12 }
  0x28   : > { %p528_p0 = pneg %p527_p13 }
  0x2a   : > { %p535_p7 = pnand %p534_p3, %p528_p0 }
  0x2c   : > { %538 = shalt.err (!%p535_p7)
}
  0x2d   : > { %s679_s18 = smov 128   ;;  %s680_s20 = smov 8  }
  0x2e   : > { %422 = dma.hbm_to_vmem [thread:$0]  (!%p777_p2), %s912_s0, 256, %s156_s28, [#allocation3], %s679_s18, %s679_s18, %s680_s20  }
  0x2f   : > { %p398_p13 = scmp.ge.s32.totalorder %s676_s16, 1  ;;  %p187_p4 = scmp.lt.s32.totalorder %s676_s16, 3 }
  0x30   : > { %s681_s30 = smov [#allocation5]   ;;  %s539_s6 = scalar_lea.hbm %s913_s1, 256 }
  0x31   : > { %p808_p8 = pnand %p398_p13, %p187_p4  ;;  %s179_s3 = sshll.u32 %s681_s30, 4  ;;  %s180_s3 = int_to_ptr.vmem [resolvable:$true] %s179_s3 }
  0x32   : > { %p540_p6 = scmp.ne.s32.totalorder %s913_s1, %s539_s6  ;;  %p546_p9 = scmp.lt.u32.totalorder %s539_s6, %s539_s6 }
  0x33   : > { %s922_s27 = scalar_select %p808_p8, 1, 0 }
  0x34   : > { %p542_p12 = pnand %p540_p6, %p511_p5  ;;  %p548_p10 = scmp.lt.u32.totalorder %s539_s6, %s913_s1 }
  0x36   : > { %p543_p0 = pneg %p542_p12  ;;  %p549_p11 = por %p548_p10, %p546_p9 }
  0x38   : > { %p550_p1 = pnand %p549_p11, %p543_p0 }
  0x3a   : > { %553 = shalt.err (!%p550_p1)
}
  0x3b   : > { %s554_s17 = scalar_lea.vmem %s180_s3, 256  ;;  %s561_s22 = scalar_lea.vmem %s180_s3, 512 }
  0x3c   : > { %p555_p3 = scmp.ne.s32.totalorder %s180_s3, %s554_s17  ;;  %p562_p4 = scmp.lt.s32.totalorder %s180_s3, %s180_s3 }
  0x3d   : > { %p563_p8 = scmp.lt.s32.totalorder %s561_s22, %s554_s17 }
  0x3e   : > { %p557_p7 = pnand %p555_p3, %p511_p5 }
  0x3f   : > { %p564_p6 = por %p563_p8, %p562_p4 }
  0x40   : > { %p558_p13 = pneg %p557_p7 }
  0x42   : > { %p565_p12 = pnand %p564_p6, %p558_p13 }
  0x44   : > { %568 = shalt.err (!%p565_p12)
}
  0x45   : > { %425 = dma.hbm_to_vmem [thread:$0]  (!%p777_p2), %s913_s1, 256, %s180_s3, [#allocation6], %s679_s18, %s679_s18, %s680_s20  }
  0x46   : > { %p923_p0 = scmp.ne.s32.totalorder %s922_s27, 0 }
  0x47   : > { %s193_s4 = sand.u32 (!%p923_p0), 1, %s664_s13   ;;  %p924_p5 = scmp.ne.s32.totalorder (!%p923_p0), %s918_s21, 0 }
  0x48   : > { %191 = sbr.rel (%p923_p0) target bundleno = 122 (0x7a), region = 28  ;;  %s399_s5 = sshll.u32 (!%p923_p0), %s193_s4, 4 }
  0x49   : > { %s194_s6 = scalar_lea.sflag (!%p923_p0), [#allocation3], %s193_s4  ;;  %s197_s7 = scalar_lea.vmem (!%p923_p0), [#allocation2], %s399_s5 }
  0x4f   : > { %634 = dma.done.wait (%p924_p5), %s194_s6, 256  }
  0x50   : > { %636 = vsyncadd (%p924_p5), %s194_s6, 4294967040  ;;  %s203_s29 = scalar_lea.sflag [#allocation6], %s193_s4  ;;  %s206_s8 = scalar_lea.vmem [#allocation5], %s399_s5 }
  0x51   : > { %638 = dma.done.wait (%p924_p5), %s203_s29, 256  }
  0x52   : > { %640 = vsyncadd (%p924_p5), %s203_s29, 4294967040  ;;  %s229_s18 = sand.u32 1, %s652_s10   ;;  %v682_v0 = vmov 0.0   ;;  %p402_p2 = scmp.ge.s32.totalorder %s668_s14, 1 }
  0x53   : > { %s401_s20 = sshll.u32 %s229_s18, 4  ;;  %v251_v1 = vld [vmem:[%s197_s7] sm:$0xff] (!%p402_p2)  ;;  %v252_v2 = vld [vmem:[%s197_s7 + $0x8] sm:$0xff] (!%p402_p2) }
  0x54   : > { %s231_s27 = scalar_lea.vmem [#allocation7], %s401_s20  ;;  %250 = sbr.rel (%p402_p2) target bundleno = 96 (0x60), region = 44  ;;  %v253_v3 = vld [vmem:[%s206_s8] sm:$0xff] (!%p402_p2)  ;;  %v254_v4 = vld [vmem:[%s206_s8 + $0x8] sm:$0xff] (!%p402_p2) }
  0x55   : > { %244 = vst [vmem:[%s231_s27] sm:$0xff] %v682_v0  ;;  %245 = vst [vmem:[%s231_s27 + $0x8] sm:$0xff] %v682_v0  ;;  %v255_v5 = vsub.f32 (!%p402_p2), %v251_v1, %v253_v3  ;;  %v256_v6 = vsub.f32 (!%p402_p2), %v252_v2, %v254_v4 }
  0x57   : > { %v257_v7 = vmul.f32 (!%p402_p2), %v255_v5, %v255_v5  ;;  %v260_v8 = vand.u32 (!%p402_p2), 2147483647, %v255_v5  ;;  %v258_v9 = vmul.f32 (!%p402_p2), %v256_v6, %v256_v6  ;;  %v261_v10 = vand.u32 (!%p402_p2), 2147483647, %v256_v6 }
  0x59   : > { %v259_v13 = vadd.f32 (!%p402_p2), %v258_v9, %v257_v7  ;;  %v262_v14 = vadd.f32 (!%p402_p2), %v261_v10, %v260_v8 }
  0x5c   : > { %v263_v11 = vld [vmem:[%s231_s27] sm:$0xff]  ;;  %v403_v12 = vld [vmem:[%s231_s27 + $0x8] sm:$0xff] }
  0x5d   : > { %v264_v15 = vadd.f32 %v263_v11, %v259_v13  ;;  %v268_v16 = vadd.f32 %v403_v12, %v262_v14 }
  0x5f   : > { %265 = vst [vmem:[%s231_s27] sm:$0xff] %v264_v15  ;;  %404 = vst [vmem:[%s231_s27 + $0x8] sm:$0xff] %v268_v16 }
  0x60 PF: > { %s412_s21 = sshll.u32 %s668_s14, 8  ;;  %s284_s17 = sshll.u32 %s231_s27, 4  ;;  %s856_s17 = int_to_ptr.vmem [resolvable:$true] %s284_s17 }
  0x61   : > { %s854_s12 = scalar_lea.hbm %s914_s2, %s412_s21  ;;  %s860_s22 = scalar_lea.sflag [#allocation4], %s229_s18 }
  0x62   : > { %s569_s23 = scalar_lea.vmem %s856_s17, 256  ;;  %p925_p9 = scmp.ne.s32.totalorder %s919_s25, 0 }
  0x63   : > { %p570_p8 = scmp.ne.s32.totalorder %s856_s17, %s569_s23  ;;  %s683_s14 = smov [#allocation7]  }
  0x64   : > { %s573_s30 = sshll.u32 %s683_s14, 4  ;;  %s574_s30 = int_to_ptr.vmem [resolvable:$false] %s573_s30 }
  0x65   : > { %p571_p10 = pnand %p570_p8, %p925_p9  ;;  %s575_s4 = scalar_lea.vmem %s574_s30, 512 }
  0x66   : > { %p576_p1 = scmp.lt.s32.totalorder %s856_s17, %s574_s30  ;;  %p577_p3 = scmp.lt.s32.totalorder %s575_s4, %s569_s23 }
  0x67   : > { %p572_p11 = pneg %p571_p10 }
  0x68   : > { %p578_p7 = por %p577_p3, %p576_p1 }
  0x6a   : > { %p579_p13 = pnand %p578_p7, %p572_p11 }
  0x6c   : > { %582 = shalt.err (!%p579_p13)
}
  0x6d   : > { %s583_s5 = scalar_lea.hbm %s854_s12, 256  ;;  %s587_s29 = scalar_lea.hbm %s914_s2, 512 }
  0x6e   : > { %p584_p4 = scmp.ne.s32.totalorder %s854_s12, %s583_s5  ;;  %p588_p0 = scmp.lt.u32.totalorder %s854_s12, %s914_s2 }
  0x6f   : > { %p589_p5 = scmp.lt.u32.totalorder %s587_s29, %s583_s5  ;;  %p591_p8 = scmp.lt.u32.totalorder %s583_s5, %s854_s12 }
  0x70   : > { %p585_p6 = pnand %p584_p4, %p925_p9 }
  0x71   : > { %p590_p2 = por %p589_p5, %p588_p0 }
  0x72   : > { %p586_p12 = pneg %p585_p6 }
  0x73   : > { %p592_p10 = por %p591_p8, %p590_p2 }
  0x75   : > { %p593_p11 = pnand %p592_p10, %p586_p12 }
  0x77   : > { %596 = shalt.err (!%p593_p11)
}
  0x78   : > { %s684_s20 = smov 128   ;;  %s685_s27 = smov 8  }
  0x79   : > { %417 = dma.vmem_to_hbm [thread:$0]  (%p925_p9), %s856_s17, 256, %s854_s12, %s860_s22, %s684_s20, %s684_s20, %s685_s27  }
  0x7a PF: > { %s299_s21 = sand.u32 1, %s648_s9   ;;  %p926_p1 = scmp.ne.s32.totalorder %s920_s26, 0 }
  0x7b   : > { %p927_p3 = scmp.ge.s32.totalorder %s676_s16, 2  ;;  %s300_s3 = scalar_lea.sflag [#allocation4], %s299_s21 }
  0x7d   : > { %p427_p7 = pnand %p927_p3, %p926_p1 }
  0x7f   : > { %642 = dma.done.wait (!%p427_p7), %s300_s3, 256  }
  0x80   : > { %644 = vsyncadd (!%p427_p7), %s300_s3, 4294967040  ;;  %s21_s16 = sadd.s32 1, %s676_s16   ;;  %s928_s9 = smov %s652_s10 }
  0x81   : > { %p18_p13 = scmp.ge.s32.totalorder %s21_s16, 4   ;;  %s929_s10 = smov %s656_s11 }
  0x82   : > { %s930_s11 = smov %s759_s24  ;;  %s931_s12 = smov %s664_s13 }
  0x83   : > { %s902_s13 = smov 0   ;;  %s932_s14 = smov %s672_s15 }
  0x84   : > { %s933_s15 = smov %s935_s19  ;;  %20 = sbr.rel (!%p18_p13) target bundleno = 9 (0x9), region = 95 }
  0x8b   :  { %305 = vsyncpa [#allocation3], 1 }
  0x8c   :  { %307 = vsyncpa [#allocation3 + $0x1], 1 }
  0x8d   :  { %308 = vsyncpa [#allocation6], 1 }
  0x8e   :  { %310 = vsyncpa [#allocation6 + $0x1], 1 }
  0x8f   :  { %311 = vsyncpa [#allocation4], 1 }
  0x90   :  { %313 = vsyncpa [#allocation4 + $0x1], 1 }

</bundles_post_ra>
